<compile_context>
chip_gen: v7x
topology: tpu7x:2x2x1
jax: 0.10.0
libtpu: 0.0.40
codegen_flags: <defaults>
</compile_context>

<pallas_src>
import math

import jax
import jax.numpy as jnp
import numpy as np
from jax.experimental import pallas as pl
from jax.experimental.pallas import tpu as pltpu


# Fixed temporal-table sizes (freq='h', embed_type='fixed').
_HOUR, _WEEKDAY, _DAY, _MONTH = 24, 7, 32, 13
_TAB_ROWS = _HOUR + _WEEKDAY + _DAY + _MONTH        # 76
_TAB_PAD = 128                                       # one full lane group
_LANE = 128
_MAX_PE_REPEAT = 64                                  # cap in-kernel jnp.tile reps


def _round_up(a, b):
    return -(-a // b) * b


# ----------------------------------------------------------------------------
# Pallas kernel
# ----------------------------------------------------------------------------
def _data_embedding_kernel(xw_ref, w_ref, mark_ref, tab_ref, pe_ref, out_ref):
    # xw_ref  : (TR, 3C)   im2col'd circular-conv windows (f32 or bf16)
    # w_ref   : (3C, Dp)   conv weight, tap-major, columns zero-padded
    # mark_ref: (TR, 1)    int32, four 8-bit temporal indices packed per row
    # tab_ref : (128, Dp)  [hour | weekday | day | month] tables, zero-padded
    # pe_ref  : (Lp, Dp)   f32 positional embedding + folded conv bias
    #                      (Lp == TR, or Lp divides TR and is tiled in-kernel)
    # out_ref : (TR, Dp)
    tr, d = out_ref.shape
    tab = tab_ref.shape[0]

    # Value embedding: circular Conv1d(k=3) as one GEMM over K = 3*C.
    acc = jnp.dot(xw_ref[...], w_ref[...], preferred_element_type=jnp.float32)

    # Temporal embedding: the four indices hit disjoint segments of the
    # combined table, so a 4-hot mask followed by one GEMM equals the sum of
    # four embedding lookups.  Indices are unpacked from one int32 per row.
    packed = mark_ref[...]                                        # (TR, 1) i32
    lanes = jax.lax.broadcasted_iota(jnp.int32, (tr, tab), 1)     # (TR, 128)
    hit = ((lanes == (packed & 0xFF))
           | (lanes == ((packed >> 8) & 0xFF))
           | (lanes == ((packed >> 16) & 0xFF))
           | (lanes == ((packed >> 24) & 0xFF)))
    hot = jnp.where(hit, 1.0, 0.0).astype(tab_ref.dtype)          # MXU dtype
    acc = acc + jnp.dot(hot, tab_ref[...], preferred_element_type=jnp.float32)

    # Positional embedding (+ folded conv bias): small (L, Dp) block, tiled
    # in-kernel across the row block (rows within a block are whole sequences).
    lp = pe_ref.shape[0]
    pe = pe_ref[...] if lp == tr else jnp.tile(pe_ref[...], (tr // lp, 1))
    out_ref[...] = (acc + pe).astype(out_ref.dtype)


def data_embedding_pallas(x_win, w2d, mark_packed, table, pe_blk, *,
                          rows_per_tile, out_dtype, vmem_limit_bytes,
                          cost_estimate):
    R, K = x_win.shape
    Dp = w2d.shape[-1]
    TR = rows_per_tile
    assert R % TR == 0
    Lp = pe_blk.shape[0]

    return pl.pallas_call(
        _data_embedding_kernel,
        out_shape=jax.ShapeDtypeStruct((R, Dp), out_dtype),
        grid_spec=pltpu.PrefetchScalarGridSpec(
            num_scalar_prefetch=0,
            grid=(R // TR,),
            in_specs=[
                pl.BlockSpec((TR, K), lambda r: (r, 0)),
                pl.BlockSpec((K, Dp), lambda r: (0, 0)),
                pl.BlockSpec((TR, 1), lambda r: (r, 0)),
                pl.BlockSpec(table.shape, lambda r: (0, 0)),
                pl.BlockSpec((Lp, Dp), lambda r: (0, 0)),
            ],
            out_specs=pl.BlockSpec((TR, Dp), lambda r: (r, 0)),
        ),
        compiler_params=pltpu.CompilerParams(
            # Single flattened row axis; 'parallel' lets v7x shard the grid
            # across its two TensorCores (no-op on single-TC v5e/v6e).
            dimension_semantics=("parallel",),
            vmem_limit_bytes=vmem_limit_bytes),
        cost_estimate=cost_estimate,
    )(x_win, w2d, mark_packed, table, pe_blk)


# ----------------------------------------------------------------------------
# Parameter / table construction (plain JAX glue, deterministic)
# ----------------------------------------------------------------------------
def sinusoidal_table(n_pos, d_model):
    """Same construction as PositionalEmbedding / FixedEmbedding."""
    pos = np.arange(n_pos, dtype=np.float32)[:, None]
    div_term = np.exp(np.arange(0, d_model, 2, dtype=np.float32)
                      * -(math.log(10000.0) / d_model))
    tab = np.zeros((n_pos, d_model), dtype=np.float32)
    tab[:, 0::2] = np.sin(pos * div_term)
    tab[:, 1::2] = np.cos(pos * div_term)
    return jnp.asarray(tab)


def init_token_conv_params(key, c_in, d_model):
    """Conv1d(c_in, d_model, k=3) with kaiming_normal_(fan_in, leaky_relu)."""
    kw, kb = jax.random.split(key)
    fan_in = c_in * 3
    gain = math.sqrt(2.0 / (1.0 + 0.01 ** 2))     # leaky_relu gain
    std = gain / math.sqrt(fan_in)
    w = std * jax.random.normal(kw, (d_model, c_in, 3), dtype=jnp.float32)
    bound = 1.0 / math.sqrt(fan_in)               # default Conv1d bias init
    b = jax.random.uniform(kb, (d_model,), jnp.float32, -bound, bound)
    return w, b


def _choose_rows_per_tile(B, L, target):
    """Pick a tile height TR = kb*L (kb | B) that is a legal block height
    (multiple of 8 unless it is the full extent), fits under `target`, and —
    when possible — keeps the grid length >= 2 (v7x has two TensorCores).
    If nothing fits under `target`, return the SMALLEST legal tile instead of
    the whole problem (guards the scoped-VMEM limit)."""
    R = B * L
    cands = []
    for kb in range(1, B + 1):
        if B % kb:
            continue
        tr = kb * L
        if tr != R and tr % 8 != 0:
            continue
        cands.append(tr)
    fitting = [t for t in cands if t <= target]
    if fitting:
        split = [t for t in fitting if R // t >= 2]
        return max(split) if split else max(fitting)
    return min(cands)


# ----------------------------------------------------------------------------
# Full forward (glue: im2col, table concat, index pack, PE+bias fold, padding)
# ----------------------------------------------------------------------------
def data_embedding_forward(x, x_mark, conv_w, conv_b, pe_full, temporal_tables,
                           *, rows_per_tile_target=2048, use_bf16=True,
                           out_dtype=None):
    """x: (B, L, c_in) f32, x_mark: (B, L, 4) int -> (B, L, d_model)."""
    B, L, C = x.shape
    D = conv_w.shape[0]
    R = B * L
    K = 3 * C
    Dp = _round_up(max(D, _LANE), _LANE)          # lane-dense output columns

    in_dtype = jnp.bfloat16 if use_bf16 else jnp.float32
    if out_dtype is None:
        out_dtype = jnp.bfloat16 if use_bf16 else jnp.float32

    # im2col for circular conv1d(k=3, padding=1, circular): columns are
    # [x[t-1] | x[t] | x[t+1]] per row (circular within each sequence).
    # TODO(synk): for large c_in, build the tap windows in-kernel (halo'd
    # BlockSpec / per-tap GEMMs) instead of materializing (R, 3C) in HBM.
    x_prev = jnp.roll(x, 1, axis=1)
    x_next = jnp.roll(x, -1, axis=1)
    x_win = jnp.concatenate([x_prev, x, x_next], axis=-1).reshape(R, K)
    x_win = x_win.astype(in_dtype)

    # conv weight (D, C, 3) -> tap-major (3, C, D) -> (3C, D), columns padded.
    w2d = jnp.transpose(conv_w, (2, 1, 0)).reshape(K, D)
    w2d = jnp.pad(w2d, ((0, 0), (0, Dp - D))).astype(in_dtype)

    # Combined fixed temporal table, zero-padded to 128 rows / Dp columns.
    hour_t, weekday_t, day_t, month_t = temporal_tables
    table = jnp.concatenate([hour_t, weekday_t, day_t, month_t], axis=0)
    table = jnp.pad(table, ((0, _TAB_PAD - _TAB_ROWS), (0, Dp - D)))
    table = table.astype(in_dtype)

    # Temporal indices: range-clamped (no silent OOB table reads), offset into
    # the combined table, and packed 4x8 bits into one int32 per row.
    xm = x_mark.astype(jnp.int32)
    hour = jnp.clip(xm[..., 3], 0, _HOUR - 1)
    weekday = jnp.clip(xm[..., 2], 0, _WEEKDAY - 1) + _HOUR
    day = jnp.clip(xm[..., 1], 0, _DAY - 1) + _HOUR + _WEEKDAY
    month = jnp.clip(xm[..., 0], 0, _MONTH - 1) + _HOUR + _WEEKDAY + _DAY
    mark_packed = (hour | (weekday << 8) | (day << 16) | (month << 24))
    mark_packed = mark_packed.astype(jnp.int32).reshape(R, 1)

    # Rows per tile: multiple of L so the PE is periodic inside a block.
    TR = _choose_rows_per_tile(B, L, rows_per_tile_target)

    # Positional embedding (+ folded conv bias), kept f32 for the final add.
    pe = (pe_full[:L] + conv_b[None, :]).astype(jnp.float32)
    pe = jnp.pad(pe, ((0, 0), (0, Dp - D)))
    small_pe_ok = (L % 8 == 0) and (TR % L == 0) and (TR // L <= _MAX_PE_REPEAT)
    pe_blk = pe if small_pe_ok else jnp.tile(pe, (TR // L, 1))

    # Advisory cost estimate + explicit VMEM budget (double-buffered working
    # set x2 headroom, clamped below v7x's 64 MiB physical VMEM).
    in_itm = jnp.dtype(in_dtype).itemsize
    out_itm = jnp.dtype(out_dtype).itemsize
    flops = 2 * R * (K + _TAB_PAD) * Dp
    bytes_accessed = (x_win.size * in_itm + w2d.size * in_itm
                      + mark_packed.size * 4 + table.size * in_itm
                      + pe_blk.size * 4 + R * Dp * out_itm)
    ce = pl.CostEstimate(flops=flops, transcendentals=0,
                         bytes_accessed=int(bytes_accessed))

    step_bytes = TR * (_round_up(K, _LANE) * in_itm + _LANE * 4 + Dp * out_itm)
    const_bytes = (_round_up(K, 8) * Dp * in_itm + _TAB_PAD * Dp * in_itm
                   + pe_blk.shape[0] * Dp * 4)
    vmem_limit = int(min(max(2 * (2 * step_bytes + 2 * const_bytes), 32 << 20),
                         56 << 20))

    out = data_embedding_pallas(x_win, w2d, mark_packed, table, pe_blk,
                                rows_per_tile=TR, out_dtype=out_dtype,
                                vmem_limit_bytes=vmem_limit, cost_estimate=ce)
    # Dropout(p=0.1) is the identity in eval mode (matches model.eval()).
    return out[:, :D].reshape(B, L, D)


# ----------------------------------------------------------------------------
# Reference (plain JAX) for sanity checking
# ----------------------------------------------------------------------------
def data_embedding_reference(x, x_mark, conv_w, conv_b, pe_full, temporal_tables):
    B, L, C = x.shape
    hp = jax.lax.Precision.HIGHEST
    x_pad = jnp.concatenate([x[:, -1:, :], x, x[:, :1, :]], axis=1)
    w_taps = jnp.transpose(conv_w, (2, 1, 0))
    y = (jnp.einsum('blc,cd->bld', x_pad[:, 0:L], w_taps[0], precision=hp)
         + jnp.einsum('blc,cd->bld', x_pad[:, 1:L + 1], w_taps[1], precision=hp)
         + jnp.einsum('blc,cd->bld', x_pad[:, 2:L + 2], w_taps[2], precision=hp)
         + conv_b[None, None, :])
    hour_t, weekday_t, day_t, month_t = temporal_tables
    temporal = (hour_t[x_mark[:, :, 3]] + weekday_t[x_mark[:, :, 2]]
                + day_t[x_mark[:, :, 1]] + month_t[x_mark[:, :, 0]])
    return y + pe_full[None, :L] + temporal


def _bf16_representable(a):
    """Round to bf16-representable f32 values so MXU pass decomposition of the
    f32 matmul is bit-exact and the f32 self-check can stay tight."""
    return jnp.asarray(a).astype(jnp.bfloat16).astype(jnp.float32)


# ----------------------------------------------------------------------------
if __name__ == "__main__":
    B, L, C_IN, D_MODEL = 4, 8, 7, 32

    key = jax.random.PRNGKey(0)
    k_x, k_mark, k_params = jax.random.split(key, 3)

    # Inputs (values rounded to bf16-representable f32, see _bf16_representable).
    x = _bf16_representable(jax.random.normal(k_x, (B, L, C_IN), jnp.float32))
    km, kd, kw_, kh = jax.random.split(k_mark, 4)
    x_mark = jnp.stack([
        jax.random.randint(km, (B, L), 0, 13),   # month
        jax.random.randint(kd, (B, L), 0, 32),   # day
        jax.random.randint(kw_, (B, L), 0, 7),   # weekday
        jax.random.randint(kh, (B, L), 0, 24),   # hour
    ], axis=-1).astype(jnp.int32)                # (B, L, 4)

    # Parameters / fixed tables (deterministic, in-script).
    conv_w, conv_b = init_token_conv_params(k_params, C_IN, D_MODEL)
    conv_w = _bf16_representable(conv_w)
    conv_b = _bf16_representable(conv_b)
    pe_full = _bf16_representable(sinusoidal_table(5000, D_MODEL))
    temporal_tables = tuple(_bf16_representable(sinusoidal_table(n, D_MODEL))
                            for n in (24, 7, 32, 13))

    ref = data_embedding_reference(x, x_mark, conv_w, conv_b, pe_full,
                                   temporal_tables)

    # f32 I/O path: tight check (operands are bf16-representable, so any MXU
    # pass decomposition of the f32 matmul is exact up to f32 accumulation).
    out_f32 = data_embedding_forward(x, x_mark, conv_w, conv_b, pe_full,
                                     temporal_tables, use_bf16=False)
    out_f32 = jax.block_until_ready(out_f32)
    np.testing.assert_allclose(np.asarray(out_f32), np.asarray(ref),
                               rtol=3e-5, atol=3e-5)
    assert out_f32.shape == (B, L, D_MODEL) and out_f32.dtype == jnp.float32

    # Production default: bf16 MXU operands + bf16 writeback (loose check —
    # the only loss is the final f32 -> bf16 output cast).
    out_bf16 = data_embedding_forward(x, x_mark, conv_w, conv_b, pe_full,
                                      temporal_tables)      # use_bf16=True
    out_bf16 = jax.block_until_ready(out_bf16)
    assert out_bf16.shape == (B, L, D_MODEL) and out_bf16.dtype == jnp.bfloat16
    np.testing.assert_allclose(np.asarray(out_bf16.astype(jnp.float32)),
                               np.asarray(ref), rtol=2e-2, atol=5e-2)

    print("KERNEL_OK")
</pallas_src>

<mosaic_0001>
module attributes {stable_mosaic.version = 11 : i64} {
  func.func @_data_embedding_kernel(%arg0: i32, %arg1: memref<16x21xf32, #tpu.memory_space<vmem>>, %arg2: memref<21x128xf32, #tpu.memory_space<vmem>>, %arg3: memref<16x1xi32, #tpu.memory_space<vmem>>, %arg4: memref<128x128xf32, #tpu.memory_space<vmem>>, %arg5: memref<8x128xf32, #tpu.memory_space<vmem>>, %arg6: memref<16x128xf32, #tpu.memory_space<vmem>>) attributes {dimension_semantics = [#tpu.dimension_semantics<parallel>], iteration_bounds = array<i64: 2>, scalar_prefetch = 0 : i64, scratch_operands = 0 : i64, tpu.core_type = #tpu.core_type<tc>, window_params = [{transform_indices = @transform_0, window_bounds = array<i64: 16, 21>}, {pipeline_mode = #tpu.pipeline_mode<synchronous>, transform_indices = @transform_1, window_bounds = array<i64: 21, 128>}, {transform_indices = @transform_2, window_bounds = array<i64: 16, 1>}, {pipeline_mode = #tpu.pipeline_mode<synchronous>, transform_indices = @transform_3, window_bounds = array<i64: 128, 128>}, {pipeline_mode = #tpu.pipeline_mode<synchronous>, transform_indices = @transform_4, window_bounds = array<i64: 8, 128>}, {transform_indices = @transform_5, window_bounds = array<i64: 16, 128>}]} {
    %c0 = arith.constant 0 : index
    %c0_0 = arith.constant 0 : index
    %0 = vector.load %arg1[%c0, %c0_0] : memref<16x21xf32, #tpu.memory_space<vmem>>, vector<16x21xf32>
    %c0_1 = arith.constant 0 : index
    %c0_2 = arith.constant 0 : index
    %1 = vector.load %arg2[%c0_1, %c0_2] : memref<21x128xf32, #tpu.memory_space<vmem>>, vector<21x128xf32>
    %cst = arith.constant dense<0.000000e+00> : vector<16x128xf32>
    %2 = tpu.matmul %0, %1, %cst {dimension_numbers = #tpu.dot_dimension_numbers<[1], [0], [0], [1], [0, 0, 1, 1], [], []>} : vector<16x21xf32>, vector<21x128xf32>, vector<16x128xf32> -> vector<16x128xf32>
    %c0_3 = arith.constant 0 : index
    %c0_4 = arith.constant 0 : index
    %3 = vector.load %arg3[%c0_3, %c0_4] : memref<16x1xi32, #tpu.memory_space<vmem>>, vector<16x1xi32>
    %4 = tpu.iota {dimensions = array<i32: 1>} : vector<16x128xi32>
    %c255_i32 = arith.constant 255 : i32
    %5 = vector.broadcast %c255_i32 : i32 to vector<16x1xi32>
    %6 = arith.andi %3, %5 : vector<16x1xi32>
    %7 = vector.broadcast %6 : vector<16x1xi32> to vector<16x128xi32>
    %8 = arith.cmpi eq, %4, %7 : vector<16x128xi32>
    %c8_i32 = arith.constant 8 : i32
    %9 = vector.broadcast %c8_i32 : i32 to vector<16x1xi32>
    %10 = arith.shrsi %3, %9 : vector<16x1xi32>
    %c255_i32_5 = arith.constant 255 : i32
    %11 = vector.broadcast %c255_i32_5 : i32 to vector<16x1xi32>
    %12 = arith.andi %10, %11 : vector<16x1xi32>
    %13 = vector.broadcast %12 : vector<16x1xi32> to vector<16x128xi32>
    %14 = arith.cmpi eq, %4, %13 : vector<16x128xi32>
    %15 = arith.ori %8, %14 : vector<16x128xi1>
    %c16_i32 = arith.constant 16 : i32
    %16 = vector.broadcast %c16_i32 : i32 to vector<16x1xi32>
    %17 = arith.shrsi %3, %16 : vector<16x1xi32>
    %c255_i32_6 = arith.constant 255 : i32
    %18 = vector.broadcast %c255_i32_6 : i32 to vector<16x1xi32>
    %19 = arith.andi %17, %18 : vector<16x1xi32>
    %20 = vector.broadcast %19 : vector<16x1xi32> to vector<16x128xi32>
    %21 = arith.cmpi eq, %4, %20 : vector<16x128xi32>
    %22 = arith.ori %15, %21 : vector<16x128xi1>
    %c24_i32 = arith.constant 24 : i32
    %23 = vector.broadcast %c24_i32 : i32 to vector<16x1xi32>
    %24 = arith.shrsi %3, %23 : vector<16x1xi32>
    %c255_i32_7 = arith.constant 255 : i32
    %25 = vector.broadcast %c255_i32_7 : i32 to vector<16x1xi32>
    %26 = arith.andi %24, %25 : vector<16x1xi32>
    %27 = vector.broadcast %26 : vector<16x1xi32> to vector<16x128xi32>
    %28 = arith.cmpi eq, %4, %27 : vector<16x128xi32>
    %29 = arith.ori %22, %28 : vector<16x128xi1>
    %cst_8 = arith.constant 1.000000e+00 : f32
    %cst_9 = arith.constant 0.000000e+00 : f32
    %30 = vector.broadcast %cst_8 : f32 to vector<16x128xf32>
    %31 = vector.broadcast %cst_9 : f32 to vector<16x128xf32>
    %32 = arith.select %29, %30, %31 : vector<16x128xi1>, vector<16x128xf32>
    %c0_10 = arith.constant 0 : index
    %c0_11 = arith.constant 0 : index
    %33 = vector.load %arg4[%c0_10, %c0_11] : memref<128x128xf32, #tpu.memory_space<vmem>>, vector<128x128xf32>
    %cst_12 = arith.constant dense<0.000000e+00> : vector<16x128xf32>
    %34 = tpu.matmul %32, %33, %cst_12 {dimension_numbers = #tpu.dot_dimension_numbers<[1], [0], [0], [1], [0, 0, 1, 1], [], []>} : vector<16x128xf32>, vector<128x128xf32>, vector<16x128xf32> -> vector<16x128xf32>
    %35 = arith.addf %2, %34 : vector<16x128xf32>
    %c0_13 = arith.constant 0 : index
    %c0_14 = arith.constant 0 : index
    %36 = vector.load %arg5[%c0_13, %c0_14] : memref<8x128xf32, #tpu.memory_space<vmem>>, vector<8x128xf32>
    %37 = tpu.concatenate %36, %36 in 0 : vector<8x128xf32>, vector<8x128xf32> -> vector<16x128xf32>
    %38 = arith.addf %35, %37 : vector<16x128xf32>
    %c0_15 = arith.constant 0 : index
    %c0_16 = arith.constant 0 : index
    %39 = vector.load %arg6[%c0_15, %c0_16] : memref<16x128xf32, #tpu.memory_space<vmem>>, vector<16x128xf32>
    tpu.vector_store %arg6[%c0_15, %c0_16], %38 {strides = array<i32>} : memref<16x128xf32, #tpu.memory_space<vmem>>, vector<16x128xf32>,
    return
  }
  func.func @transform_0(%arg0: i32) -> (i32, i32) {
    %c0_i32 = arith.constant 0 : i32
    %c0_i32_0 = arith.constant 0 : i32
    return %arg0, %c0_i32 : i32, i32
  }
  func.func @transform_1(%arg0: i32) -> (i32, i32) {
    %c0_i32 = arith.constant 0 : i32
    %c0_i32_0 = arith.constant 0 : i32
    %c0_i32_1 = arith.constant 0 : i32
    return %c0_i32, %c0_i32_0 : i32, i32
  }
  func.func @transform_2(%arg0: i32) -> (i32, i32) {
    %c0_i32 = arith.constant 0 : i32
    %c0_i32_0 = arith.constant 0 : i32
    return %arg0, %c0_i32 : i32, i32
  }
  func.func @transform_3(%arg0: i32) -> (i32, i32) {
    %c0_i32 = arith.constant 0 : i32
    %c0_i32_0 = arith.constant 0 : i32
    %c0_i32_1 = arith.constant 0 : i32
    return %c0_i32, %c0_i32_0 : i32, i32
  }
  func.func @transform_4(%arg0: i32) -> (i32, i32) {
    %c0_i32 = arith.constant 0 : i32
    %c0_i32_0 = arith.constant 0 : i32
    %c0_i32_1 = arith.constant 0 : i32
    return %c0_i32, %c0_i32_0 : i32, i32
  }
  func.func @transform_5(%arg0: i32) -> (i32, i32) {
    %c0_i32 = arith.constant 0 : i32
    %c0_i32_0 = arith.constant 0 : i32
    return %arg0, %c0_i32 : i32, i32
  }
}

</mosaic_0001>

<bundles_post_ra>
// kernel: tpu_custom_call.1
= control target key start
LH: loop header
LB: loop body
LE: loop exit
PB: predicated region body
PF: predicated region fallthrough
CT: control target
= control target key end

     0   :  { %10 = vsyncpa [#allocation3], 0  ;;  %s1088_s0 = inlined_call_operand.vmem [shape: f32[32,21], index: 0, kind: input, shape index: {}]   ;;  %s1089_s1 = inlined_call_operand.vmem [shape: f32[21,128], index: 1, kind: input, shape index: {}]   ;;  %s1090_s2 = inlined_call_operand.vmem [shape: s32[32,1], index: 2, kind: input, shape index: {}]   ;;  %s1091_s3 = inlined_call_operand.hbm [shape: f32[128,128], index: 3, kind: input, shape index: {}]   ;;  %s1092_s4 = inlined_call_operand.vmem [shape: f32[8,128], index: 4, kind: input, shape index: {}]   ;;  %s1093_s5 = inlined_call_operand.hbm [shape: f32[32,128], index: 5, kind: output, shape index: {}]  }
   0x1   :  { %11 = vsyncpa [#allocation4], 0 }
   0x2   :  { %13 = vsyncpa [#allocation4 + $0x1], 0  ;;  %s929_s18 = smov 0   ;;  %s931_s19 = smov 0  }
   0x3   :  { %s933_s20 = smov 0   ;;  %s935_s21 = smov 0  }
   0x4 LB: > { %s950_s22 = sadd.s32 4294967295, %s889_s21   ;;  %s608_s23 = sadd.s32 4294967294, %s889_s21   ;;  %s889_s21 = sphi %s935_s21, %s1109_s21   ;;  %s885_s20 = sphi %s933_s20, %s1108_s20   ;;  %s881_s19 = sphi %s931_s19, %s1107_s19   ;;  %s877_s18 = sphi %s929_s18, %s1106_s18  }
   0x5   : > { %s954_s24 = sadd.s32 1, %s889_s21   ;;  %s141_s25 = sadd.s32 1, %s885_s20 }
   0x6   : > { %s138_s26 = ssub.s32 %s889_s21, %s954_s24  ;;  %p151_p0 = scmp.ne.s32.totalorder %s885_s20, %s881_s19 }
   0x7   : > { %p139_p1 = scmp.eq.s32.totalorder %s138_s26, 0  ;;  %p152_p2 = scmp.eq.s32.totalorder %s950_s22, 1 }
   0x8   : > { %p157_p3 = scmp.ne.s32.totalorder %s881_s19, %s877_s18  ;;  %p158_p4 = scmp.eq.s32.totalorder %s608_s23, 1 }
   0x9   : > { %s965_s27 = scalar_select %p139_p1, %s885_s20, %s141_s25  }
   0xa   : > { %p967_p5 = por %p152_p2, %p151_p0  ;;  %p971_p6 = por %p158_p4, %p157_p3 }
   0xb   : > { %p609_p7 = scmp.ge.s32.totalorder %s889_s21, 1  ;;  %p165_p8 = scmp.lt.s32.totalorder %s889_s21, 3 }
   0xc   : > { %s1097_s28 = scalar_select %p967_p5, 1, 0 }
   0xd   : > { %s1098_s29 = scalar_select %p971_p6, 1, 0 }
   0xe   : > { %p1094_p9 = scmp.eq.s32.totalorder %s950_s22, 0  ;;  %p978_p10 = pnand %p609_p7, %p165_p8 }
   0xf   : > { %s891_s6 = smov [#allocation2]   ;;  %s795_s11 = scalar_lea.hbm %s1091_s3, 2048 }
  0x10   : > { %s1099_s30 = scalar_select %p978_p10, 1, 0 }
  0x11   : > { %s180_s7 = sshll.u32 %s891_s6, 4  ;;  %p743_p11 = pneg %p978_p10  ;;  %s181_s7 = int_to_ptr.vmem [resolvable:$true] %s180_s7 }
  0x12   : > { %p796_p13 = scmp.ne.s32.totalorder %s1091_s3, %s795_s11  ;;  %p802_p3 = scmp.lt.u32.totalorder %s795_s11, %s1091_s3 }
  0x13   : > { %p986_p12 = pnand %p1094_p9, %p743_p11 }
  0x15   : > { %p797_p0 = pneg %p986_p12 }
  0x17   : > { %p798_p1 = pnand %p797_p0, %p796_p13 }
  0x19   : > { %p799_p2 = pneg %p798_p1 }
  0x1b   : > { %p804_p4 = pnand %p802_p3, %p799_p2 }
  0x1d   : > { %807 = shalt.err (!%p804_p4)
}
  0x1e   : > { %s808_s16 = scalar_lea.vmem %s181_s7, 2048  ;;  %p816_p9 = scmp.lt.s32.totalorder %s181_s7, %s181_s7 }
  0x1f   : > { %p809_p7 = scmp.ne.s32.totalorder %s181_s7, %s808_s16  ;;  %p817_p6 = scmp.lt.s32.totalorder %s808_s16, %s808_s16 }
  0x21   : > { %p811_p8 = pnand %p809_p7, %p797_p0  ;;  %p818_p5 = por %p817_p6, %p816_p9 }
  0x23   : > { %p812_p11 = pneg %p811_p8 }
  0x25   : > { %p819_p10 = pnand %p818_p5, %p812_p11 }
  0x27   : > { %822 = shalt.err (!%p819_p10)
}
  0x28   : > { %s892_s17 = smov 128   ;;  %s893_s23 = smov 8  }
  0x29   : > { %746 = dma.hbm_to_vmem [thread:$0]  (!%p986_p12), %s1091_s3, 2048, %s181_s7, [#allocation3], %s892_s17, %s892_s17, %s893_s23  }
  0x2a   : > { %p1101_p13 = scmp.ne.s32.totalorder %s1099_s30, 0 }
  0x2b   : > { %p1102_p1 = scmp.eq.s32.totalorder (!%p1101_p13), %s950_s22, 0 }
  0x2c   : > { %217 = sbr.rel (%p1101_p13) target bundleno = 437 (0x1b5), region = 40 }
  0x33   : > { %868 = dma.done.wait (%p1102_p1), [#allocation3], 2048   ;;  %p1103_p0 = pmov %p1102_p1 }
  0x34   : > { %s615_s6 = sshll.u32 %s950_s22, 1  ;;  %v894_v0 = vmov 0   ;;  %v326_v3 = vld [vmem:[#allocation2] sm:$0xff]  ;;  %v327_v8 = vld [vmem:[#allocation2 + $0x8] sm:$0xff]  ;;  %v328_v9 = vld [vmem:[#allocation2 + $0x10] sm:$0xff]  ;;  %vm424_vm0 = vcmask 1044480   ;;  %v270_v47 = vlaneseq }
  0x35   : > { %870 = vsyncadd (%p1103_p0), [#allocation3], 4294965248  ;;  %794 = vset.pattern.permute.xlu1 %v894_v0  ;;  %793 = vset.pattern.permute.xlu0 %v894_v0  ;;  %p251_p5 = scmp.lt.s32.totalorder %s615_s6, 3  ;;  %v329_v11 = vld [vmem:[#allocation2 + $0x18] sm:$0xff]  ;;  %v699_v15 = vpack.c.bf16 %v327_v8, %v326_v3  ;;  %v330_v17 = vld [vmem:[#allocation2 + $0x20] sm:$0xff]  ;;  %vm417_vm1 = vcmask 171008  }
  0x36   : > { %v703_v16 = vpack.c.bf16 %v329_v11, %v328_v9  ;;  %v331_v18 = vld [vmem:[#allocation2 + $0x28] sm:$0xff]  ;;  %v332_v22 = vld [vmem:[#allocation2 + $0x30] sm:$0xff]  ;;  %v333_v23 = vld [vmem:[#allocation2 + $0x38] sm:$0xff]  ;;  %v271_v50 = vand.u32 127, %v270_v47  ;;  %v895_v55 = vmov 1.0   ;;  %s247_s25 = sand.u32 1, %s881_s19  }
  0x37   : > { %s1111_s6 = smov (!%p251_p5, %s615_s6), 3  ;;  %700 = vmatprep.subr.bf16.mxu1 %v699_v15  ;;  %v707_v21 = vpack.c.bf16 %v331_v18, %v330_v17  ;;  %v265_v24 = vld [vmem:[%s1089_s1] sm:$0xff]  ;;  %v266_v25 = vld [vmem:[%s1089_s1 + $0x8] sm:$0xff]  ;;  %v711_v29 = vpack.c.bf16 %v333_v23, %v332_v22  ;;  %v336_v33 = vld [vmem:[#allocation2 + $0x50] sm:$0xff]  ;;  %s614_s26 = sshll.u32 %s247_s25, 4 }
  0x38   : > { %s616_s7 = sshll.u32 %s1111_s6, 3  ;;  %702 = vmatpush3.bf16.msra.mxu1 %v699_v15  ;;  %v731_v26 = vpack.c.bf16 %v266_v25, %v265_v24  ;;  %v334_v30 = vld [vmem:[#allocation2 + $0x40] sm:$0xff]  ;;  %v335_v31 = vld [vmem:[#allocation2 + $0x48] sm:$0xff]  ;;  %v267_v34 = vld [vmem:[%s1089_s1 + $0x10] sm:$0x1f]  ;;  %s249_s30 = scalar_lea.vmem [#allocation5], %s614_s26 }
  0x39   : > { %s260_s9 = scalar_lea.vmem %s1090_s2, %s616_s7  ;;  %704 = vmatprep.subr.bf16.mxu1 %v703_v16  ;;  %v715_v32 = vpack.c.bf16 %v335_v31, %v334_v30  ;;  %s254_s23 = scalar_lea.vmem %s1088_s0, %s616_s7  ;;  %v337_v35 = vld [vmem:[#allocation2 + $0x58] sm:$0xff]  ;;  %v338_v39 = vld [vmem:[#allocation2 + $0x60] sm:$0xff]  ;;  %v339_v40 = vld [vmem:[#allocation2 + $0x68] sm:$0xff] }
  0x3a   : > { %v269_v1 = vld [vmem:[%s260_s9 + $0x8] sm:$0xff]  ;;  %v268_v2 = vld [vmem:[%s260_s9] sm:$0xff]  ;;  %732 = vmatprep.subr.bf16.mxu0 %v731_v26  ;;  %v719_v38 = vpack.c.bf16 %v337_v35, %v336_v33  ;;  %v723_v41 = vpack.c.bf16 %v339_v40, %v338_v39  ;;  %v340_v42 = vld [vmem:[#allocation2 + $0x70] sm:$0xff]  ;;  %s522_s8 = sshll.u32 %s249_s30, 4  ;;  %s631_s9 = sshll.u32 %s950_s22, 8  ;;  %s1040_s8 = int_to_ptr.vmem [resolvable:$true] %s522_s8 }
  0x3b   : > { %v273_v4 = vand.u32 255, %v269_v1  ;;  %v272_v5 = vand.u32 255, %v268_v2  ;;  %v283_v6 = vshra.s32 %v269_v1, 8  ;;  %v282_v7 = vshra.s32 %v268_v2, 8  ;;  %734 = vmatpush3.bf16.msra.mxu0 %v731_v26  ;;  %v263_v36 = vld [vmem:[%s254_s23] sm:$0xff]  ;;  %v264_v37 = vld [vmem:[%s254_s23 + $0x8] sm:$0xff]  ;;  %s1045_s12 = scalar_lea.hbm %s1093_s5, %s631_s9 }
  0x3c   : > { %v297_v10 = vshra.s32 %v269_v1, 16  ;;  %v296_v14 = vshra.s32 %v268_v2, 16  ;;  %706 = vmatpush3.bf16.msra.mxu1 %v703_v16  ;;  %v620_v27 = vshrl.u32 %v269_v1, 24  ;;  %v619_v28 = vshrl.u32 %v268_v2, 24  ;;  %694 = vmatprep.subr.msk.mxu0 %vm424_vm0, %v267_v34  ;;  %v341_v43 = vld [vmem:[#allocation2 + $0x78] sm:$0xff]  ;;  %v503_v59 = vld [vmem:[%s1092_s4] sm:$0xff] }
  0x3d   : > { %278 = vperm.xlu1 %794, %v273_v4   ;;  %275 = vperm.xlu0 %793, %v272_v5   ;;  %v285_v12 = vand.u32 255, %v283_v6  ;;  %v284_v13 = vand.u32 255, %v282_v7  ;;  %v727_v44 = vpack.c.bf16 %v341_v43, %v340_v42  ;;  %s1047_s13 = scalar_lea.sflag [#allocation4], %s247_s25  ;;  %s823_s22 = scalar_lea.vmem %s1040_s8, 256 }
  0x3e   : > { %v299_v19 = vand.u32 255, %v297_v10  ;;  %v298_v20 = vand.u32 255, %v296_v14  ;;  %708 = vmatprep.subr.bf16.mxu1 %v707_v21  ;;  %696 = vmatprep.mubr.msk.f32.mxu0 %vm417_vm1, %v263_v36  ;;  %p824_p6 = scmp.ne.s32.totalorder %s1040_s8, %s823_s22  ;;  %p1104_p9 = scmp.ne.s32.totalorder %s1097_s28, 0 }
  0x3f   : > { %695 = vmatpush3.msk.msra.mxu0 %vm424_vm0, %v267_v34  ;;  %s896_s14 = smov [#allocation5]  }
  0x40   : > { %710 = vmatpush3.bf16.msra.mxu1 %v707_v21  ;;  %697 = vmatmul.mubr.msk.f32.vlgmr.msra.gmra.mrb[0].mxu0 %vm417_vm1, %v264_v37  ;;  %p825_p10 = pnand %p824_p6, %p1104_p9  ;;  %s827_s15 = sshll.u32 %s896_s14, 4  ;;  %s828_s15 = int_to_ptr.vmem [resolvable:$false] %s827_s15 }
  0x41   : > { %290 = vperm.xlu1 %794, %v285_v12   ;;  %287 = vperm.xlu0 %793, %v284_v13   ;;  %s829_s16 = scalar_lea.vmem %s828_s15, 512  ;;  %p830_p2 = scmp.lt.s32.totalorder %s1040_s8, %s828_s15 }
  0x42   : > { %712 = vmatprep.subr.bf16.mxu1 %v711_v29  ;;  %p826_p12 = pneg %p825_p10  ;;  %p831_p3 = scmp.lt.s32.totalorder %s829_s16, %s823_s22 }
  0x44   : > { %714 = vmatpush3.bf16.msra.mxu1 %v711_v29  ;;  %p832_p4 = por %p831_p3, %p830_p2 }
  0x45   : > { %304 = vperm.xlu1 %794, %v299_v19   ;;  %301 = vperm.xlu0 %793, %v298_v20  }
  0x46   : > { %716 = vmatprep.subr.bf16.mxu1 %v715_v32  ;;  %p833_p7 = pnand %p832_p4, %p826_p12 }
  0x48   : > { %718 = vmatpush3.bf16.msra.mxu1 %v715_v32 }
  0x49   : > { %318 = vperm.xlu1 %794, %v620_v27   ;;  %315 = vperm.xlu0 %793, %v619_v28  }
  0x4a   : > { %720 = vmatprep.subr.bf16.mxu1 %v719_v38 }
  0x4c   : > { %722 = vmatpush3.bf16.msra.mxu1 %v719_v38 }
  0x4d   : > { %724 = vmatprep.subr.bf16.mxu1 %v723_v41 }
  0x50   : > { %726 = vmatpush3.bf16.msra.mxu1 %v723_v41 }
  0x51   : > { %728 = vmatprep.subr.bf16.mxu1 %v727_v44 }
  0x54   : > { %730 = vmatpush3.bf16.msra.mxu1 %v727_v44 }
  0xbc   : > { %v279_v45 = vpop.permute.xlu1 %278  ;;  %v276_v46 = vpop.permute.xlu0 %275 }
  0xbd   : > { %vm281_vm4 = vcmp.eq.s32.totalorder %v271_v50, %v279_v45  ;;  %vm280_vm6 = vcmp.eq.s32.totalorder %v271_v50, %v276_v46 }
  0xc0   : > { %v291_v48 = vpop.permute.xlu1 %290  ;;  %v288_v49 = vpop.permute.xlu0 %287 }
  0xc1   : > { %vm293_vm2 = vcmp.eq.s32.totalorder %v271_v50, %v291_v48  ;;  %vm292_vm3 = vcmp.eq.s32.totalorder %v271_v50, %v288_v49 }
  0xc2   : > { %vm295_vm7 = vmor %vm281_vm4, %vm293_vm2 }
  0xc3   : > { %vm294_vm9 = vmor %vm280_vm6, %vm292_vm3 }
  0xc4   : > { %v305_v51 = vpop.permute.xlu1 %304  ;;  %v302_v52 = vpop.permute.xlu0 %301 }
  0xc5   : > { %vm307_vm5 = vcmp.eq.s32.totalorder %v271_v50, %v305_v51  ;;  %vm306_vm8 = vcmp.eq.s32.totalorder %v271_v50, %v302_v52 }
  0xc6   : > { %vm309_vm10 = vmor %vm295_vm7, %vm307_vm5 }
  0xc7   : > { %vm308_vm13 = vmor %vm294_vm9, %vm306_vm8 }
  0xc8   : > { %v319_v53 = vpop.permute.xlu1 %318  ;;  %v316_v54 = vpop.permute.xlu0 %315 }
  0xc9   : > { %vm321_vm11 = vcmp.eq.s32.totalorder %v271_v50, %v319_v53  ;;  %vm320_vm12 = vcmp.eq.s32.totalorder %v271_v50, %v316_v54 }
  0xca   : > { %vm323_vm14 = vmor %vm309_vm10, %vm321_vm11 }
  0xcb   : > { %vm322_vm15 = vmor %vm308_vm13, %vm320_vm12 }
  0xcc   : > { %687 = vmatprep.mubr.msk.f32.mxu1 %vm322_vm15, %v895_v55 }
  0xcd   : > { %688 = vmatmul.mubr.msk.f32.vlgmr.msra.gmra.mrb[0].mxu1 %vm323_vm14, %v895_v55 }
 0x113   : > { %v698_v56 = vpop.f32.mrb[0].mxu0 }
 0x114   : > { %v494_v57 = vpop.f32.mrb[1].mxu0 }
 0x1a0   : > { %v689_v58 = vpop.f32.mrb[0].mxu1 }
 0x1a1   : > { %v500_v60 = vadd.f32 %v698_v56, %v689_v58  ;;  %v408_v61 = vpop.f32.mrb[1].mxu1 }
 0x1a2   : > { %v495_v62 = vadd.f32 %v494_v57, %v408_v61 }
 0x1a3   : > { %v505_v63 = vadd.f32 %v503_v59, %v500_v60 }
 0x1a4   : > { %v504_v0 = vadd.f32 %v503_v59, %v495_v62 }
 0x1a5   : > { %507 = vst [vmem:[%s249_s30 + $0x8] sm:$0xff] %v505_v63 }
 0x1a6   : > { %506 = vst [vmem:[%s249_s30] sm:$0xff] %v504_v0 }
 0x1a7   : > { %836 = shalt.err (!%p833_p7)
}
 0x1a8   : > { %s837_s17 = scalar_lea.hbm %s1045_s12, 256  ;;  %s841_s26 = scalar_lea.hbm %s1093_s5, 512 }
 0x1a9   : > { %p838_p8 = scmp.ne.s32.totalorder %s1045_s12, %s837_s17  ;;  %p842_p1 = scmp.lt.u32.totalorder %s1045_s12, %s1093_s5 }
 0x1aa   : > { %p843_p0 = scmp.lt.u32.totalorder %s841_s26, %s837_s17  ;;  %p845_p6 = scmp.lt.u32.totalorder %s837_s17, %s1045_s12 }
 0x1ab   : > { %p839_p11 = pnand %p838_p8, %p1104_p9 }
 0x1ac   : > { %p844_p5 = por %p843_p0, %p842_p1 }
 0x1ad   : > { %p840_p13 = pneg %p839_p11 }
 0x1ae   : > { %p846_p10 = por %p845_p6, %p844_p5 }
 0x1b0   : > { %p847_p12 = pnand %p846_p10, %p840_p13 }
 0x1b2   : > { %850 = shalt.err (!%p847_p12)
}
 0x1b3   : > { %s897_s30 = smov 128   ;;  %s898_s9 = smov 8  }
 0x1b4   : > { %741 = dma.vmem_to_hbm [thread:$0]  (%p1104_p9), %s1040_s8, 256, %s1045_s12, %s1047_s13, %s897_s30, %s897_s30, %s898_s9  }
 0x1b5 PF: > { %p753_p2 = scmp.ge.s32.totalorder %s889_s21, 2  ;;  %s537_s10 = sand.u32 1, %s877_s18  }
 0x1b6   : > { %p1105_p3 = scmp.ne.s32.totalorder %s1098_s29, 0  ;;  %s538_s11 = scalar_lea.sflag [#allocation4], %s537_s10 }
 0x1b8   : > { %p748_p4 = pnand %p753_p2, %p1105_p3 }
 0x1ba   : > { %872 = dma.done.wait (!%p748_p4), %s538_s11, 256  }
 0x1bb   : > { %874 = vsyncadd (!%p748_p4), %s538_s11, 4294967040  ;;  %p16_p7 = scmp.ge.s32.totalorder %s954_s24, 4   ;;  %s1106_s18 = smov %s881_s19 }
 0x1bc   : > { %s1107_s19 = smov %s885_s20  ;;  %s1108_s20 = smov %s965_s27 }
 0x1bd   : > { %s1109_s21 = smov %s954_s24  ;;  %18 = sbr.rel (!%p16_p7) target bundleno = 4 (0x4), region = 83 }
 0x1c4   :  { %543 = vsyncpa [#allocation3], 1 }
 0x1c5   :  { %545 = vsyncpa [#allocation3 + $0x1], 1 }
 0x1c6   :  { %546 = vsyncpa [#allocation4], 1 }
 0x1c7   :  { %548 = vsyncpa [#allocation4 + $0x1], 1 }

</bundles_post_ra>
